<compile_context>
chip_gen: v6e
topology: v6e:2x2x1
jax: 0.10.0
libtpu: 0.0.40
codegen_flags: <defaults>
</compile_context>

<pallas_src>
import jax
import jax.numpy as jnp
from jax.experimental import pallas as pl
from jax.experimental.pallas import tpu as pltpu

LANE = 128      # vreg lane width
SUBLANE = 8     # f32 sublane tile


def _round_up(x, m):
    return (x + m - 1) // m * m


def actor_kernel(x_ref, w1_ref, w2_ref, w3_ref, b12_ref, tail_ref, o_ref):
    """One batch tile of the Actor MLP: fc1->relu->fc2->relu->fc_mu->tanh->affine.

    x_ref:    (block_m, obs_dim)  f32
    w1_ref:   (obs_dim, hidden)   bf16
    w2_ref:   (hidden, hidden)    bf16
    w3_ref:   (hidden, LANE)      bf16  (fc_mu weight, act_dim lane-padded to 128)
    b12_ref:  (2, hidden)         f32   row0 = b1, row1 = b2
    tail_ref: (3, LANE)           f32   row0 = b3, row1 = action_scale, row2 = action_bias
    o_ref:    (block_m, LANE)     f32
    """
    # fc1 + relu (bf16 MXU inputs, f32 accumulation)
    h1 = jnp.dot(x_ref[...].astype(jnp.bfloat16), w1_ref[...],
                 preferred_element_type=jnp.float32)
    h1 = jnp.maximum(h1 + b12_ref[0:1, :], 0.0)
    # fc2 + relu
    h2 = jnp.dot(h1.astype(jnp.bfloat16), w2_ref[...],
                 preferred_element_type=jnp.float32)
    h2 = jnp.maximum(h2 + b12_ref[1:2, :], 0.0)
    # fc_mu + tanh, then scale/shift into the action range (lane-dense store)
    mu = jnp.dot(h2.astype(jnp.bfloat16), w3_ref[...],
                 preferred_element_type=jnp.float32)
    mu = jnp.tanh(mu + tail_ref[0:1, :])
    o_ref[...] = mu * tail_ref[1:2, :] + tail_ref[2:3, :]


def prepare_params(params):
    """One-time layout plumbing: bf16 weights, lane-padded fc_mu, packed bias rows."""
    w1, b1, w2, b2, w3, b3, action_scale, action_bias = params
    hidden, act_dim = w3.shape
    n_pad = _round_up(max(act_dim, LANE), LANE)

    def pad_row(r):  # (1, act_dim) -> (1, n_pad), zero-padded lanes
        return jnp.zeros((1, n_pad), jnp.float32).at[:, :act_dim].set(r)

    w3_p = jnp.zeros((hidden, n_pad), jnp.float32).at[:, :act_dim].set(w3)
    b12 = jnp.concatenate([b1, b2], axis=0)                               # (2, hidden)
    tail = jnp.concatenate(
        [pad_row(b3), pad_row(action_scale), pad_row(action_bias)], axis=0)  # (3, n_pad)

    return (w1.astype(jnp.bfloat16),
            w2.astype(jnp.bfloat16),
            w3_p.astype(jnp.bfloat16),
            b12, tail, act_dim)


def actor_forward(x, prepared):
    """Full Actor forward pass in one Pallas kernel (batch tiled over a parallel grid)."""
    w1, w2, w3_p, b12, tail, act_dim = prepared
    B, obs_dim = x.shape
    n_pad = w3_p.shape[1]

    # Batch tiling: pad to the sublane tile for tiny batches, 256-row blocks
    # for large batches (full MXU passes with hidden=256, shards across v7x cores).
    block_m = 256 if B > 256 else _round_up(max(B, SUBLANE), SUBLANE)
    B_pad = _round_up(B, block_m)
    x_p = x if B_pad == B else jnp.pad(x, ((0, B_pad - B), (0, 0)))

    def full_spec(shape):
        return pl.BlockSpec(shape, lambda i: (0,) * len(shape))

    out = pl.pallas_call(
        actor_kernel,
        out_shape=jax.ShapeDtypeStruct((B_pad, n_pad), jnp.float32),
        grid=(B_pad // block_m,),
        in_specs=[
            pl.BlockSpec((block_m, obs_dim), lambda i: (i, 0)),
            full_spec(w1.shape),
            full_spec(w2.shape),
            full_spec(w3_p.shape),
            full_spec(b12.shape),
            full_spec(tail.shape),
        ],
        out_specs=pl.BlockSpec((block_m, n_pad), lambda i: (i, 0)),
        compiler_params=pltpu.CompilerParams(
            dimension_semantics=("parallel",)),
    )(x_p, w1, w2, w3_p, b12, tail)
    return out[:B, :act_dim]


def actor_reference_bf16(x, params):
    """Plain-JAX reference mirroring the kernel's bf16-input / f32-accumulate math."""
    w1, b1, w2, b2, w3, b3, action_scale, action_bias = params
    bf = jnp.bfloat16
    h1 = jax.nn.relu(jnp.dot(x.astype(bf), w1.astype(bf),
                             preferred_element_type=jnp.float32) + b1)
    h2 = jax.nn.relu(jnp.dot(h1.astype(bf), w2.astype(bf),
                             preferred_element_type=jnp.float32) + b2)
    mu = jnp.tanh(jnp.dot(h2.astype(bf), w3.astype(bf),
                          preferred_element_type=jnp.float32) + b3)
    return mu * action_scale + action_bias


def actor_reference_f32(x, params):
    """Full-precision reference (loose sanity check for the bf16 kernel)."""
    w1, b1, w2, b2, w3, b3, action_scale, action_bias = params
    h1 = jax.nn.relu(x @ w1 + b1)
    h2 = jax.nn.relu(h1 @ w2 + b2)
    mu = jnp.tanh(h2 @ w3 + b3)
    return mu * action_scale + action_bias


def make_params(key, obs_dim, hidden, act_dim):
    """Deterministic parameter init (uniform, PyTorch-Linear-like bounds)."""
    ks = jax.random.split(key, 6)

    def linear(kw, kb, fan_in, fan_out):
        bound = 1.0 / jnp.sqrt(jnp.float32(fan_in))
        w = jax.random.uniform(kw, (fan_in, fan_out), jnp.float32, -bound, bound)
        b = jax.random.uniform(kb, (1, fan_out), jnp.float32, -bound, bound)
        return w, b

    w1, b1 = linear(ks[0], ks[1], obs_dim, hidden)
    w2, b2 = linear(ks[2], ks[3], hidden, hidden)
    w3, b3 = linear(ks[4], ks[5], hidden, act_dim)

    # Synthetic action space: low = -2, high = 2  ->  scale = 2, bias = 0
    action_scale = jnp.full((1, act_dim), 2.0, dtype=jnp.float32)
    action_bias = jnp.zeros((1, act_dim), dtype=jnp.float32)
    return (w1, b1, w2, b2, w3, b3, action_scale, action_bias)


if __name__ == "__main__":
    key = jax.random.PRNGKey(0)
    k_params, k_x = jax.random.split(key)

    batch = 2
    obs_dim = 16     # np.prod(env.single_observation_space.shape)
    hidden = 256
    act_dim = 4      # np.prod(env.single_action_space.shape)

    params = make_params(k_params, obs_dim, hidden, act_dim)
    prepared = prepare_params(params)
    x = jax.random.normal(k_x, (batch, obs_dim), dtype=jnp.float32)

    out = jax.block_until_ready(actor_forward(x, prepared))

    ref_bf16 = actor_reference_bf16(x, params)
    ref_f32 = actor_reference_f32(x, params)
    assert out.shape == (batch, act_dim)
    assert jnp.allclose(out, ref_bf16, atol=2e-3, rtol=2e-3), "mismatch vs bf16 reference"
    assert jnp.allclose(out, ref_f32, atol=5e-2, rtol=5e-2), "mismatch vs f32 reference"

    print("KERNEL_OK")
</pallas_src>

<mosaic_0001>
module attributes {stable_mosaic.version = 11 : i64} {
  func.func @actor_kernel(%arg0: i32, %arg1: memref<8x16xf32, #tpu.memory_space<vmem>>, %arg2: memref<16x256xbf16, #tpu.memory_space<vmem>>, %arg3: memref<256x256xbf16, #tpu.memory_space<vmem>>, %arg4: memref<256x128xbf16, #tpu.memory_space<vmem>>, %arg5: memref<2x256xf32, #tpu.memory_space<vmem>>, %arg6: memref<3x128xf32, #tpu.memory_space<vmem>>, %arg7: memref<8x128xf32, #tpu.memory_space<vmem>>) attributes {dimension_semantics = [#tpu.dimension_semantics<parallel>], iteration_bounds = array<i64: 1>, scalar_prefetch = 0 : i64, scratch_operands = 0 : i64, tpu.core_type = #tpu.core_type<tc>, window_params = [{transform_indices = @transform_0, window_bounds = array<i64: 8, 16>}, {pipeline_mode = #tpu.pipeline_mode<synchronous>, transform_indices = @transform_1, window_bounds = array<i64: 16, 256>}, {pipeline_mode = #tpu.pipeline_mode<synchronous>, transform_indices = @transform_2, window_bounds = array<i64: 256, 256>}, {pipeline_mode = #tpu.pipeline_mode<synchronous>, transform_indices = @transform_3, window_bounds = array<i64: 256, 128>}, {pipeline_mode = #tpu.pipeline_mode<synchronous>, transform_indices = @transform_4, window_bounds = array<i64: 2, 256>}, {pipeline_mode = #tpu.pipeline_mode<synchronous>, transform_indices = @transform_5, window_bounds = array<i64: 3, 128>}, {transform_indices = @transform_6, window_bounds = array<i64: 8, 128>}]} {
    %c0 = arith.constant 0 : index
    %c0_0 = arith.constant 0 : index
    %0 = vector.load %arg1[%c0, %c0_0] : memref<8x16xf32, #tpu.memory_space<vmem>>, vector<8x16xf32>
    %1 = arith.truncf %0 : vector<8x16xf32> to vector<8x16xbf16>
    %c0_1 = arith.constant 0 : index
    %c0_2 = arith.constant 0 : index
    %2 = vector.load %arg2[%c0_1, %c0_2] : memref<16x256xbf16, #tpu.memory_space<vmem>>, vector<16x256xbf16>
    %cst = arith.constant dense<0.000000e+00> : vector<8x256xf32>
    %3 = tpu.matmul %1, %2, %cst {dimension_numbers = #tpu.dot_dimension_numbers<[1], [0], [0], [1], [0, 0, 1, 1], [], []>} : vector<8x16xbf16>, vector<16x256xbf16>, vector<8x256xf32> -> vector<8x256xf32>
    %c0_3 = arith.constant 0 : index
    %c0_4 = arith.constant 0 : index
    %4 = vector.load %arg5[%c0_3, %c0_4] : memref<2x256xf32, #tpu.memory_space<vmem>>, vector<1x256xf32>
    %5 = vector.broadcast %4 : vector<1x256xf32> to vector<8x256xf32>
    %6 = arith.addf %3, %5 : vector<8x256xf32>
    %cst_5 = arith.constant 0.000000e+00 : f32
    %7 = vector.broadcast %cst_5 : f32 to vector<8x256xf32>
    %8 = arith.maximumf %6, %7 : vector<8x256xf32>
    %9 = arith.truncf %8 : vector<8x256xf32> to vector<8x256xbf16>
    %c0_6 = arith.constant 0 : index
    %c0_7 = arith.constant 0 : index
    %10 = vector.load %arg3[%c0_6, %c0_7] : memref<256x256xbf16, #tpu.memory_space<vmem>>, vector<256x256xbf16>
    %cst_8 = arith.constant dense<0.000000e+00> : vector<8x256xf32>
    %11 = tpu.matmul %9, %10, %cst_8 {dimension_numbers = #tpu.dot_dimension_numbers<[1], [0], [0], [1], [0, 0, 1, 1], [], []>} : vector<8x256xbf16>, vector<256x256xbf16>, vector<8x256xf32> -> vector<8x256xf32>
    %c1 = arith.constant 1 : index
    %c0_9 = arith.constant 0 : index
    %12 = vector.load %arg5[%c1, %c0_9] : memref<2x256xf32, #tpu.memory_space<vmem>>, vector<1x256xf32>
    %13 = vector.broadcast %12 : vector<1x256xf32> to vector<8x256xf32>
    %14 = arith.addf %11, %13 : vector<8x256xf32>
    %cst_10 = arith.constant 0.000000e+00 : f32
    %15 = vector.broadcast %cst_10 : f32 to vector<8x256xf32>
    %16 = arith.maximumf %14, %15 : vector<8x256xf32>
    %17 = arith.truncf %16 : vector<8x256xf32> to vector<8x256xbf16>
    %c0_11 = arith.constant 0 : index
    %c0_12 = arith.constant 0 : index
    %18 = vector.load %arg4[%c0_11, %c0_12] : memref<256x128xbf16, #tpu.memory_space<vmem>>, vector<256x128xbf16>
    %cst_13 = arith.constant dense<0.000000e+00> : vector<8x128xf32>
    %19 = tpu.matmul %17, %18, %cst_13 {dimension_numbers = #tpu.dot_dimension_numbers<[1], [0], [0], [1], [0, 0, 1, 1], [], []>} : vector<8x256xbf16>, vector<256x128xbf16>, vector<8x128xf32> -> vector<8x128xf32>
    %c0_14 = arith.constant 0 : index
    %c0_15 = arith.constant 0 : index
    %20 = vector.load %arg6[%c0_14, %c0_15] : memref<3x128xf32, #tpu.memory_space<vmem>>, vector<1x128xf32>
    %21 = vector.broadcast %20 : vector<1x128xf32> to vector<8x128xf32>
    %22 = arith.addf %19, %21 : vector<8x128xf32>
    %23 = math.tanh %22 : vector<8x128xf32>
    %c1_16 = arith.constant 1 : index
    %c0_17 = arith.constant 0 : index
    %24 = vector.load %arg6[%c1_16, %c0_17] : memref<3x128xf32, #tpu.memory_space<vmem>>, vector<1x128xf32>
    %25 = vector.broadcast %24 : vector<1x128xf32> to vector<8x128xf32>
    %26 = arith.mulf %23, %25 : vector<8x128xf32>
    %c2 = arith.constant 2 : index
    %c0_18 = arith.constant 0 : index
    %27 = vector.load %arg6[%c2, %c0_18] : memref<3x128xf32, #tpu.memory_space<vmem>>, vector<1x128xf32>
    %28 = vector.broadcast %27 : vector<1x128xf32> to vector<8x128xf32>
    %29 = arith.addf %26, %28 : vector<8x128xf32>
    %c0_19 = arith.constant 0 : index
    %c0_20 = arith.constant 0 : index
    %30 = vector.load %arg7[%c0_19, %c0_20] : memref<8x128xf32, #tpu.memory_space<vmem>>, vector<8x128xf32>
    tpu.vector_store %arg7[%c0_19, %c0_20], %29 {strides = array<i32>} : memref<8x128xf32, #tpu.memory_space<vmem>>, vector<8x128xf32>,
    return
  }
  func.func @transform_0(%arg0: i32) -> (i32, i32) {
    %c0_i32 = arith.constant 0 : i32
    %c0_i32_0 = arith.constant 0 : i32
    return %arg0, %c0_i32 : i32, i32
  }
  func.func @transform_1(%arg0: i32) -> (i32, i32) {
    %c0_i32 = arith.constant 0 : i32
    %c0_i32_0 = arith.constant 0 : i32
    %c0_i32_1 = arith.constant 0 : i32
    return %c0_i32, %c0_i32_0 : i32, i32
  }
  func.func @transform_2(%arg0: i32) -> (i32, i32) {
    %c0_i32 = arith.constant 0 : i32
    %c0_i32_0 = arith.constant 0 : i32
    %c0_i32_1 = arith.constant 0 : i32
    return %c0_i32, %c0_i32_0 : i32, i32
  }
  func.func @transform_3(%arg0: i32) -> (i32, i32) {
    %c0_i32 = arith.constant 0 : i32
    %c0_i32_0 = arith.constant 0 : i32
    %c0_i32_1 = arith.constant 0 : i32
    return %c0_i32, %c0_i32_0 : i32, i32
  }
  func.func @transform_4(%arg0: i32) -> (i32, i32) {
    %c0_i32 = arith.constant 0 : i32
    %c0_i32_0 = arith.constant 0 : i32
    %c0_i32_1 = arith.constant 0 : i32
    return %c0_i32, %c0_i32_0 : i32, i32
  }
  func.func @transform_5(%arg0: i32) -> (i32, i32) {
    %c0_i32 = arith.constant 0 : i32
    %c0_i32_0 = arith.constant 0 : i32
    %c0_i32_1 = arith.constant 0 : i32
    return %c0_i32, %c0_i32_0 : i32, i32
  }
  func.func @transform_6(%arg0: i32) -> (i32, i32) {
    %c0_i32 = arith.constant 0 : i32
    %c0_i32_0 = arith.constant 0 : i32
    return %arg0, %c0_i32 : i32, i32
  }
}

</mosaic_0001>

<bundles_post_ra>
// kernel: tpu_custom_call.1
= control target key start
LH: loop header
LB: loop body
LE: loop exit
PB: predicated region body
PF: predicated region fallthrough
CT: control target
= control target key end

     0   :  { %11 = vsyncpa [#allocation3], 0  ;;  %s946_s0 = inlined_call_operand.hbm [shape: f32[8,16], index: 0, kind: input, shape index: {}]   ;;  %s947_s1 = inlined_call_operand.hbm [shape: bf16[16,256], index: 1, kind: input, shape index: {}]   ;;  %s948_s2 = inlined_call_operand.hbm [shape: bf16[256,256], index: 2, kind: input, shape index: {}]   ;;  %s949_s3 = inlined_call_operand.hbm [shape: bf16[256,128], index: 3, kind: input, shape index: {}]   ;;  %s950_s4 = inlined_call_operand.vmem [shape: f32[2,256], index: 4, kind: input, shape index: {}]   ;;  %s951_s5 = inlined_call_operand.vmem [shape: f32[3,128], index: 5, kind: input, shape index: {}]   ;;  %s952_s6 = inlined_call_operand.hbm [shape: f32[8,128], index: 6, kind: output, shape index: {}]  }
   0x1   :  { %12 = vsyncpa [#allocation6], 0 }
   0x2   :  { %13 = vsyncpa [#allocation9], 0 }
   0x3   :  { %14 = vsyncpa [#allocation4], 0  ;;  %s871_s21 = smov [#allocation5]  }
   0x4   :  { %s30_s22 = sshll.u32 %s871_s21, 4  ;;  %s31_s22 = int_to_ptr.vmem [resolvable:$true] %s30_s22 }
   0x5   :  { %s771_s23 = scalar_lea.vmem %s31_s22, 256  ;;  %p776_p1 = scmp.lt.s32.totalorder %s31_s22, %s31_s22 }
   0x6   :  { %p772_p0 = scmp.ne.s32.totalorder %s31_s22, %s771_s23  ;;  %p777_p2 = scmp.lt.s32.totalorder %s771_s23, %s771_s23 }
   0x8   :  { %p778_p3 = por %p777_p2, %p776_p1 }
   0xa   :  { %p779_p4 = pnand %p778_p3, %p772_p0 }
   0xc   :  { %782 = shalt.err (!%p779_p4)
}
   0xd   :  { %s872_s24 = smov 128   ;;  %s873_s25 = smov 8  }
   0xe   :  { %36 = dma.hbm_to_vmem [thread:$0]  %s947_s1, 256, %s31_s22, [#allocation6], %s872_s24, %s872_s24, %s873_s25  }
   0xf   :  { %s874_s28 = smov [#allocation2]   ;;  %s875_s30 = smov [#allocation7]  }
  0x10   :  { %s21_s29 = sshll.u32 %s874_s28, 4  ;;  %s42_s7 = sshll.u32 %s875_s30, 4  ;;  %s22_s29 = int_to_ptr.vmem [resolvable:$true] %s21_s29  ;;  %s43_s7 = int_to_ptr.vmem [resolvable:$true] %s42_s7 }
  0x11   :  { %s791_s8 = scalar_lea.vmem %s22_s29, 128  ;;  %p796_p6 = scmp.lt.s32.totalorder %s22_s29, %s22_s29 }
  0x12   :  { %p792_p5 = scmp.ne.s32.totalorder %s22_s29, %s791_s8  ;;  %p797_p7 = scmp.lt.s32.totalorder %s791_s8, %s791_s8 }
  0x14   :  { %p798_p8 = por %p797_p7, %p796_p6 }
  0x16   :  { %p799_p9 = pnand %p798_p8, %p792_p5 }
  0x18   :  { %802 = shalt.err (!%p799_p9)
}
  0x19   :  { %24 = dma.hbm_to_vmem [thread:$0]  %s946_s0, 128, %s22_s29, [#allocation3]  }
  0x1a   :  { %s811_s11 = scalar_lea.vmem %s43_s7, 4096  ;;  %p816_p11 = scmp.lt.s32.totalorder %s43_s7, %s43_s7 }
  0x1b   :  { %p812_p10 = scmp.ne.s32.totalorder %s43_s7, %s811_s11  ;;  %p817_p12 = scmp.lt.s32.totalorder %s811_s11, %s811_s11 }
  0x1d   :  { %p818_p13 = por %p817_p12, %p816_p11 }
  0x1f   :  { %p819_p0 = pnand %p818_p13, %p812_p10 }
  0x21   :  { %822 = shalt.err (!%p819_p0)
}
  0x22   :  { %48 = dma.hbm_to_vmem [thread:$0]  %s948_s2, 4096, %s43_s7, [#allocation6], %s872_s24, %s872_s24, %s873_s25  }
  0x23   :  { %s876_s13 = smov [#allocation8]  }
  0x24   :  { %s54_s14 = sshll.u32 %s876_s13, 4  ;;  %s55_s14 = int_to_ptr.vmem [resolvable:$true] %s54_s14 }
  0x25   :  { %s831_s15 = scalar_lea.vmem %s55_s14, 2048  ;;  %p836_p2 = scmp.lt.s32.totalorder %s55_s14, %s55_s14 }
  0x26   :  { %p832_p1 = scmp.ne.s32.totalorder %s55_s14, %s831_s15  ;;  %p837_p3 = scmp.lt.s32.totalorder %s831_s15, %s831_s15 }
  0x28   :  { %p838_p4 = por %p837_p3, %p836_p2 }
  0x2a   :  { %p839_p5 = pnand %p838_p4, %p832_p1 }
  0x2c   :  { %842 = shalt.err (!%p839_p5)
}
  0x2d   :  { %s877_s0 = smov 64   ;;  %s878_s16 = smov 4  }
  0x2e   :  { %60 = dma.hbm_to_vmem [thread:$0]  %s949_s3, 2048, %s55_s14, [#allocation9], %s877_s0, %s877_s0, %s878_s16  }
  0x2f   :  { %863 = dma.done.wait [#allocation3], 128  }
  0x30   :  { %864 = vsyncadd [#allocation3], 4294967168 }
  0x31   :  { %865 = dma.done.wait [#allocation6], 4352  }
  0x32   :  { %866 = vsyncadd [#allocation6], 4294962944 }
  0x33   :  { %867 = dma.done.wait [#allocation9], 2048  }
  0x34   :  { %868 = vsyncadd [#allocation9], 4294965248  ;;  %v879_v0 = vmov 0   ;;  %v694_v1 = vld [vmem:[#allocation5 + $0x4] ss:$8 sps:$4 sm:$0xff]   ;;  %v78_v3 = vld [vmem:[#allocation2] sm:$0xff]  ;;  %v84_v49 = vlaneseq }
  0x35   :  { %140 = vmatprep.mubr.bf16.mxu0 %v879_v0  ;;  %v696_v2 = vld [vmem:[#allocation5] ss:$8 sps:$4 sm:$0xff]   ;;  %122 = vmatprep.subr.bf16.mxu0 %v694_v1  ;;  %v79_v4 = vpack.c.bf16 %v78_v3, %v78_v3  ;;  %v697_v5 = vld [vmem:[#allocation7 + $0x74] ss:$8 sps:$4 sm:$0xff]   ;;  %vm104_vm0 = vcmask 130048   ;;  %v749_v41 = vld [vmem:[#allocation8 + $0x68] sm:$0xff]  }
  0x36   :  { %v699_v6 = vld [vmem:[#allocation7 + $0x70] ss:$8 sps:$4 sm:$0xff]   ;;  %123 = vmatpush1.bf16.msra.mxu0 %v696_v2  ;;  %v700_v7 = vld [vmem:[#allocation7 + $0x64] ss:$8 sps:$4 sm:$0xff]   ;;  %358 = vmatprep.subr.bf16.mxu1 %v697_v5  ;;  %v702_v8 = vld [vmem:[#allocation7 + $0x60] ss:$8 sps:$4 sm:$0xff]  }
  0x37   :  { %359 = vmatpush1.bf16.msra.mxu1 %v699_v6  ;;  %v703_v9 = vld [vmem:[#allocation7 + $0x54] ss:$8 sps:$4 sm:$0xff]   ;;  %v705_v10 = vld [vmem:[#allocation7 + $0x50] ss:$8 sps:$4 sm:$0xff]   ;;  %v706_v11 = vld [vmem:[#allocation7 + $0x44] ss:$8 sps:$4 sm:$0xff]  }
  0x38   :  { %360 = vmatprep.subr.bf16.mxu1 %v700_v7  ;;  %v708_v12 = vld [vmem:[#allocation7 + $0x40] ss:$8 sps:$4 sm:$0xff]   ;;  %v709_v13 = vld [vmem:[#allocation7 + $0x34] ss:$8 sps:$4 sm:$0xff]   ;;  %v711_v14 = vld [vmem:[#allocation7 + $0x30] ss:$8 sps:$4 sm:$0xff]  }
  0x39   :  { %609 = vmatmul.mubr.msk.bf16.vlgmr.msra.gmra.mxu0 %vm104_vm0, %v79_v4  ;;  %v712_v15 = vld [vmem:[#allocation7 + $0x24] ss:$8 sps:$4 sm:$0xff]   ;;  %v714_v16 = vld [vmem:[#allocation7 + $0x20] ss:$8 sps:$4 sm:$0xff]   ;;  %v715_v17 = vld [vmem:[#allocation7 + $0x14] ss:$8 sps:$4 sm:$0xff]  }
  0x3a   :  { %v717_v18 = vld [vmem:[#allocation7 + $0x10] ss:$8 sps:$4 sm:$0xff]   ;;  %v718_v19 = vld [vmem:[#allocation7 + $0x4] ss:$8 sps:$4 sm:$0xff]   ;;  %v720_v20 = vld [vmem:[#allocation7] ss:$8 sps:$4 sm:$0xff]  }
  0x3b   :  { %361 = vmatpush1.bf16.msra.mxu1 %v702_v8  ;;  %v721_v21 = vld [vmem:[#allocation7 + $0xf4] ss:$8 sps:$4 sm:$0xff]   ;;  %v723_v22 = vld [vmem:[#allocation7 + $0xf0] ss:$8 sps:$4 sm:$0xff]   ;;  %v724_v23 = vld [vmem:[#allocation7 + $0xe4] ss:$8 sps:$4 sm:$0xff]  }
  0x3c   :  { %362 = vmatprep.subr.bf16.mxu1 %v703_v9  ;;  %v726_v24 = vld [vmem:[#allocation7 + $0xe0] ss:$8 sps:$4 sm:$0xff]   ;;  %v727_v25 = vld [vmem:[#allocation7 + $0xd4] ss:$8 sps:$4 sm:$0xff]   ;;  %v729_v26 = vld [vmem:[#allocation7 + $0xd0] ss:$8 sps:$4 sm:$0xff]  }
  0x3d   :  { %v730_v27 = vld [vmem:[#allocation7 + $0xc4] ss:$8 sps:$4 sm:$0xff]   ;;  %v732_v28 = vld [vmem:[#allocation7 + $0xc0] ss:$8 sps:$4 sm:$0xff]   ;;  %v733_v29 = vld [vmem:[#allocation7 + $0xb4] ss:$8 sps:$4 sm:$0xff]  }
  0x3e   :  { %v735_v30 = vld [vmem:[#allocation7 + $0xb0] ss:$8 sps:$4 sm:$0xff]   ;;  %v736_v31 = vld [vmem:[#allocation7 + $0xa4] ss:$8 sps:$4 sm:$0xff]   ;;  %v738_v32 = vld [vmem:[#allocation7 + $0xa0] ss:$8 sps:$4 sm:$0xff]  }
  0x3f   :  { %363 = vmatpush1.bf16.msra.mxu1 %v705_v10  ;;  %v739_v33 = vld [vmem:[#allocation7 + $0x94] ss:$8 sps:$4 sm:$0xff]   ;;  %v741_v34 = vld [vmem:[#allocation7 + $0x90] ss:$8 sps:$4 sm:$0xff]   ;;  %v742_v35 = vld [vmem:[#allocation7 + $0x84] ss:$8 sps:$4 sm:$0xff]  }
  0x40   :  { %364 = vmatprep.subr.bf16.mxu1 %v706_v11  ;;  %v744_v36 = vld [vmem:[#allocation7 + $0x80] ss:$8 sps:$4 sm:$0xff]   ;;  %v745_v37 = vld [vmem:[#allocation8 + $0x78] sm:$0xff]   ;;  %v747_v39 = vld [vmem:[#allocation8 + $0x70] sm:$0xff]   ;;  %v85_v50 = vshrl.u32 %v84_v49, 7  ;;  %s880_s26 = smov [#allocation10]  }
  0x41   :  { %v746_v38 = vld [vmem:[#allocation8 + $0x38] sm:$0xff]   ;;  %662 = vmatprep.subr.bf16.mxu0 %v745_v37  ;;  %v748_v40 = vld [vmem:[#allocation8 + $0x30] sm:$0xff]   ;;  %v750_v42 = vld [vmem:[#allocation8 + $0x28] sm:$0xff]   ;;  %s596_s27 = sshll.u32 %s880_s26, 4  ;;  %s597_s27 = int_to_ptr.vmem [resolvable:$true] %s596_s27 }
  0x42   :  { %663 = vmatpush3.bf16.msra.mxu0 %v746_v38  ;;  %v751_v43 = vld [vmem:[#allocation8 + $0x60] sm:$0xff]   ;;  %v753_v45 = vld [vmem:[#allocation8 + $0x58] sm:$0xff]   ;;  %v755_v47 = vld [vmem:[#allocation8 + $0x50] sm:$0xff]   ;;  %v86_v51 = vsub.s32 0, %v85_v50  ;;  %v90_v53 = vsub.s32 1, %v85_v50  ;;  %s843_s28 = scalar_lea.vmem %s597_s27, 128  ;;  %p848_p7 = scmp.lt.s32.totalorder %s597_s27, %s597_s27 }
  0x43   :  { %365 = vmatpush1.bf16.msra.mxu1 %v708_v12  ;;  %664 = vmatprep.subr.bf16.mxu0 %v747_v39  ;;  %v752_v44 = vld [vmem:[#allocation8 + $0x20] sm:$0xff]   ;;  %v754_v46 = vld [vmem:[#allocation8 + $0x18] sm:$0xff]   ;;  %v756_v48 = vld [vmem:[#allocation8 + $0x10] sm:$0xff]   ;;  %p844_p6 = scmp.ne.s32.totalorder %s597_s27, %s843_s28  ;;  %p849_p8 = scmp.lt.s32.totalorder %s843_s28, %s843_s28 }
  0x44   :  { %366 = vmatprep.subr.bf16.mxu1 %v709_v13  ;;  %v82_v52 = vld [vmem:[%s950_s4] ss:$2 sm:$0x3]  ;;  %v759_v4 = vld [vmem:[#allocation8 + $0x40] sm:$0xff]  }
  0x45   :  { %v87_v54 = vrot.slane %v82_v52, %v86_v51  ;;  %v91_v55 = vrot.slane %v82_v52, %v90_v53  ;;  %v757_v2 = vld [vmem:[#allocation8 + $0x48] sm:$0xff]   ;;  %v760_v5 = vld [vmem:[#allocation8] sm:$0xff]   ;;  %p850_p9 = por %p849_p8, %p848_p7 }
  0x46   :  { %665 = vmatpush3.bf16.msra.mxu0 %v748_v40  ;;  %v758_v3 = vld [vmem:[#allocation8 + $0x8] sm:$0xff]  }
  0x47   :  { %367 = vmatpush1.bf16.msra.mxu1 %v711_v14  ;;  %666 = vmatprep.subr.bf16.mxu0 %v749_v41  ;;  %v610_v6 = vld [vmem:[%s950_s4 + $0x1] ss:$2 sm:$0x3]  ;;  %p851_p10 = pnand %p850_p9, %p844_p6 }
  0x48   :  { %368 = vmatprep.subr.bf16.mxu1 %v712_v15  ;;  %v191_v7 = vrot.slane %v610_v6, %v86_v51  ;;  %v195_v8 = vrot.slane %v610_v6, %v90_v53 }
  0x4a   :  { %667 = vmatpush3.bf16.msra.mxu0 %v750_v42 }
  0x4b   :  { %369 = vmatpush1.bf16.msra.mxu1 %v714_v16  ;;  %668 = vmatprep.subr.bf16.mxu0 %v751_v43 }
  0x4c   :  { %370 = vmatprep.subr.bf16.mxu1 %v715_v17 }
  0x4e   :  { %669 = vmatpush3.bf16.msra.mxu0 %v752_v44 }
  0x4f   :  { %371 = vmatpush1.bf16.msra.mxu1 %v717_v18  ;;  %670 = vmatprep.subr.bf16.mxu0 %v753_v45 }
  0x50   :  { %372 = vmatprep.subr.bf16.mxu1 %v718_v19 }
  0x52   :  { %671 = vmatpush3.bf16.msra.mxu0 %v754_v46 }
  0x53   :  { %373 = vmatpush1.bf16.msra.mxu1 %v720_v20  ;;  %672 = vmatprep.subr.bf16.mxu0 %v755_v47  ;;  %v643_v20 = vld [vmem:[%s951_s5] ss:$0 sm:$0xff] }
  0x54   :  { %374 = vmatprep.subr.bf16.mxu1 %v721_v21 }
  0x56   :  { %673 = vmatpush3.bf16.msra.mxu0 %v756_v48 }
  0x57   :  { %375 = vmatpush2.bf16.msra.mxu1 %v723_v22  ;;  %674 = vmatprep.subr.bf16.mxu0 %v757_v2 }
  0x58   :  { %376 = vmatprep.subr.bf16.mxu1 %v724_v23 }
  0x5a   :  { %675 = vmatpush3.bf16.msra.mxu0 %v758_v3 }
  0x5b   :  { %377 = vmatpush2.bf16.msra.mxu1 %v726_v24  ;;  %676 = vmatprep.subr.bf16.mxu0 %v759_v4 }
  0x5c   :  { %378 = vmatprep.subr.bf16.mxu1 %v727_v25 }
  0x5e   :  { %677 = vmatpush3.bf16.msra.mxu0 %v760_v5 }
  0x5f   :  { %379 = vmatpush2.bf16.msra.mxu1 %v729_v26  ;;  %v660_v26 = vld [vmem:[%s951_s5 + $0x1] ss:$0 sm:$0xff] }
  0x60   :  { %380 = vmatprep.subr.bf16.mxu1 %v730_v27 }
  0x63   :  { %381 = vmatpush2.bf16.msra.mxu1 %v732_v28  ;;  %v661_v28 = vld [vmem:[%s951_s5 + $0x2] ss:$0 sm:$0xff] }
  0x64   :  { %382 = vmatprep.subr.bf16.mxu1 %v733_v29 }
  0x67   :  { %383 = vmatpush2.bf16.msra.mxu1 %v735_v30 }
  0x68   :  { %384 = vmatprep.subr.bf16.mxu1 %v736_v31 }
  0x6b   :  { %385 = vmatpush2.bf16.msra.mxu1 %v738_v32 }
  0x6c   :  { %386 = vmatprep.subr.bf16.mxu1 %v739_v33 }
  0x6f   :  { %387 = vmatpush2.bf16.msra.mxu1 %v741_v34 }
  0x70   :  { %388 = vmatprep.subr.bf16.mxu1 %v742_v35 }
  0x73   :  { %389 = vmatpush2.bf16.msra.mxu1 %v744_v36 }
  0xf9   :  { %v142_v56 = vpop.f32.mrf.mxu0 }
  0xfa   :  { %v143_v57 = vadd.f32 %v142_v56, %v87_v54 }
  0xfb   :  { %v144_v58 = vpop.f32.mrf.mxu0 }
  0xfc   :  { %v145_v59 = vadd.f32 %v144_v58, %v91_v55  ;;  %v149_v60 = vmax.f32 %v143_v57, 0.0 }
  0xfd   :  { %v146_v61 = vpop.f32.mrf.mxu0 }
  0xfe   :  { %v150_v62 = vmax.f32 %v145_v59, 0.0  ;;  %v151_v1 = vpack.c.bf16 %v149_v60, %v149_v60 }
  0xff   :  { %v147_v63 = vpop.f32.mrf.mxu0 }
 0x100   :  { %v152_v0 = vpack.c.bf16 %v150_v62, %v150_v62 }
 0x102   :  { %390 = vmatprep.mubr.bf16.mxu1 %v152_v0 }
 0x103   :  { %391 = vmatmul.mubr.bf16.vlgmr.msra.gmra.mxu1 %v151_v1 }
 0x1c3   :  { %v392_v9 = vpop.f32.mrf.mxu1 }
 0x1c4   :  { %v393_v10 = vadd.f32 %v392_v9, %v191_v7 }
 0x1c5   :  { %v394_v11 = vpop.f32.mrf.mxu1 }
 0x1c6   :  { %v395_v12 = vadd.f32 %v394_v11, %v195_v8  ;;  %v399_v13 = vmax.f32 %v393_v10, 0.0 }
 0x1c7   :  { %v396_v14 = vpop.f32.mrf.mxu1 }
 0x1c8   :  { %v400_v15 = vmax.f32 %v395_v12, 0.0  ;;  %v401_v18 = vpack.c.bf16 %v399_v13, %v399_v13 }
 0x1c9   :  { %v397_v16 = vpop.f32.mrf.mxu1 }
 0x1ca   :  { %v402_v17 = vpack.c.bf16 %v400_v15, %v400_v15 }
 0x1cc   :  { %568 = vmatprep.mubr.bf16.mxu0 %v402_v17 }
 0x1cd   :  { %569 = vmatmul.mubr.bf16.vlgmr.msra.gmra.mxu0 %v401_v18 }
 0x28d   :  { %v678_v19 = vpop.f32.mrf.mxu0 }
 0x28f   :  { %v679_v21 = vpop.f32.mrf.mxu0 }
 0x290   :  { %v680_v22 = vadd.f32 %v679_v21, %v678_v19 }
 0x291   :  { %v681_v23 = vpop.f32.mrf.mxu0 }
 0x292   :  { %v571_v24 = vadd.f32 %v680_v22, %v643_v20 }
 0x293   :  { %v682_v25 = vpop.f32.mrf.mxu0 }
 0x294   :  { %761 = vtanh.f32 %v571_v24 }
 0x2a1   :  { %v762_v27 = vpop.eup %761 }
 0x2a2   :  { %v582_v29 = vmul.f32 %v762_v27, %v660_v26 }
 0x2a4   :  { %v588_v30 = vadd.f32 %v661_v28, %v582_v29 }
 0x2a6   :  { %589 = vst [vmem:[#allocation10] sm:$0xff] %v588_v30 }
 0x2a7   :  { %854 = shalt.err (!%p851_p10)
}
 0x2a8   :  { %599 = dma.vmem_to_hbm [thread:$0]  %s597_s27, 128, %s952_s6, [#allocation4]  }
 0x2a9   :  { %869 = dma.done.wait [#allocation4], 128  }
 0x2aa   :  { %870 = vsyncadd [#allocation4], 4294967168 }
 0x2ab   :  { %603 = vsyncpa [#allocation3], 1 }
 0x2ac   :  { %604 = vsyncpa [#allocation6], 1 }
 0x2ad   :  { %605 = vsyncpa [#allocation9], 1 }
 0x2ae   :  { %606 = vsyncpa [#allocation4], 1 }

</bundles_post_ra>
